<compile_context>
chip_gen: v7x
topology: tpu7x:2x2x1
jax: 0.10.0
libtpu: 0.0.40
codegen_flags: <defaults>
</compile_context>

<pallas_src>
import functools

import jax
import jax.numpy as jnp
from jax.experimental import pallas as pl
from jax.experimental.pallas import tpu as pltpu


def _round_up(x, m):
    return ((x + m - 1) // m) * m


# ---------------------------------------------------------------------------
# Kernels
# ---------------------------------------------------------------------------
def _single_k_kernel(x_ref, w_ref, b_ref, o_ref, *, mxu_dtype, precision):
    """Whole reduction resident in VMEM: one dot, bias add, store. No scratch."""
    x = x_ref[...]
    w = w_ref[...]
    if mxu_dtype is not None:
        x = x.astype(mxu_dtype)
        w = w.astype(mxu_dtype)
    acc = jnp.dot(x, w, preferred_element_type=jnp.float32, precision=precision)
    o_ref[...] = (acc + b_ref[...].astype(jnp.float32)).astype(o_ref.dtype)


def _multi_k_kernel(x_ref, w_ref, b_ref, o_ref, acc_ref, *, mxu_dtype, precision):
    """K-tiled matmul: f32 VMEM accumulator, bias added once on the last K step."""
    k = pl.program_id(2)

    @pl.when(k == 0)
    def _():
        acc_ref[...] = jnp.zeros_like(acc_ref)

    x = x_ref[...]
    w = w_ref[...]
    if mxu_dtype is not None:
        x = x.astype(mxu_dtype)
        w = w.astype(mxu_dtype)
    acc_ref[...] += jnp.dot(
        x, w, preferred_element_type=jnp.float32, precision=precision
    )

    @pl.when(k == pl.num_programs(2) - 1)
    def _():
        o_ref[...] = (acc_ref[...] + b_ref[...].astype(jnp.float32)).astype(
            o_ref.dtype
        )


# ---------------------------------------------------------------------------
# Per-generation tiling
# ---------------------------------------------------------------------------
def _vmem_capacity_bytes():
    try:
        info = pltpu.get_tpu_info()
        cap = getattr(info, "vmem_capacity_bytes", None)
        if cap:
            return int(cap)
    except Exception:
        pass
    try:
        kind = jax.devices()[0].device_kind.lower()
        if any(t in kind for t in ("v4", "v5", "v6")):
            return 128 * 1024 * 1024
    except Exception:
        pass
    return 64 * 1024 * 1024  # conservative (v7x-sized)


def _tile_config():
    """Return (tm, tn, tk, vmem_limit_bytes) for this TPU generation."""
    cap = _vmem_capacity_bytes()
    if cap >= 96 * 1024 * 1024:
        # v4 / v5e / v6e: 128 MiB physical VMEM -> big tiles, ~100 MiB scoped.
        return 512, 1024, 1024, 100 * 1024 * 1024
    # v7x: 64 MiB per TensorCore -> leave headroom for compiler scratch/sems.
    return 256, 1024, 1024, 56 * 1024 * 1024


_SINGLE_K_MAX = 2048  # largest K kept un-tiled (whole reduction resident in VMEM)


# ---------------------------------------------------------------------------
# Wrapper
# ---------------------------------------------------------------------------
def linear_pallas(x, w_t, b, *, mxu_dtype=jnp.bfloat16):
    """y = x @ w_t + b  (PyTorch nn.Linear forward, weight pre-transposed).

    x:   (..., K)  — leading dims are flattened into M.
    w_t: (K, N)    — store a persistent bf16 copy outside the hot path to halve
                     weight HBM traffic; any dtype is accepted (cast per-tile).
    b:   (N,) or (1, N)
    mxu_dtype: MXU operand dtype (default bf16, f32 accumulation). Pass None
               for full-f32 MXU via Precision.HIGHEST (~3x MXU cost).
    """
    lead = x.shape[:-1]
    K = x.shape[-1]
    K2, N = w_t.shape
    assert K == K2, (K, K2)

    x2 = x.reshape(-1, K)
    M = x2.shape[0]
    b2 = jnp.reshape(b, (1, N))
    out_dtype = x.dtype
    precision = None if mxu_dtype is not None else jax.lax.Precision.HIGHEST

    tm_t, tn_t, tk_t, vmem_limit = _tile_config()

    # M / N are never padded: edge tiles come from a cdiv grid; OOB input
    # rows/cols are unspecified but masked off at output writeback.
    tm = M if M <= tm_t else tm_t
    tn = N if N <= tn_t else tn_t
    grid_m = pl.cdiv(M, tm)
    grid_n = pl.cdiv(N, tn)

    # K (reduction) is the only axis that genuinely needs zero padding, and
    # only when it must be split across grid steps.
    if K <= _SINGLE_K_MAX:
        grid_k, tk, Kp = 1, K, K  # full-dim block: no pad, no accumulator dance
    else:
        grid_k = pl.cdiv(K, tk_t)
        tk = _round_up(pl.cdiv(K, grid_k), 128)
        Kp = grid_k * tk
        if Kp != K:
            # NOTE: callers on a hot path should pre-pad K once instead of
            # paying this HBM round trip per call.
            x2 = jnp.pad(x2, ((0, 0), (0, Kp - K)))
            w_t = jnp.pad(w_t, ((0, Kp - K), (0, 0)))

    # Truthful cost estimate: padded K and tiling re-read factors.
    flops = 2 * M * N * Kp
    bytes_accessed = int(
        M * Kp * x2.dtype.itemsize * grid_n        # x re-read once per N tile
        + Kp * N * w_t.dtype.itemsize * grid_m     # W re-read once per M tile
        + N * b2.dtype.itemsize * grid_m
        + M * N * jnp.dtype(out_dtype).itemsize
    )
    cost = pl.CostEstimate(
        flops=flops, transcendentals=0, bytes_accessed=bytes_accessed
    )

    if grid_k == 1:
        kernel = functools.partial(
            _single_k_kernel, mxu_dtype=mxu_dtype, precision=precision
        )
        grid = (grid_m, grid_n)
        in_specs = [
            pl.BlockSpec((tm, tk), lambda i, j: (i, 0)),
            pl.BlockSpec((tk, tn), lambda i, j: (0, j)),
            pl.BlockSpec((1, tn), lambda i, j: (0, j)),
        ]
        out_specs = pl.BlockSpec((tm, tn), lambda i, j: (i, j))
        scratch_shapes = []
        dims = ("parallel", "parallel")
    else:
        kernel = functools.partial(
            _multi_k_kernel, mxu_dtype=mxu_dtype, precision=precision
        )
        grid = (grid_m, grid_n, grid_k)
        in_specs = [
            pl.BlockSpec((tm, tk), lambda i, j, k: (i, k)),
            pl.BlockSpec((tk, tn), lambda i, j, k: (k, j)),
            pl.BlockSpec((1, tn), lambda i, j, k: (0, j)),
        ]
        out_specs = pl.BlockSpec((tm, tn), lambda i, j, k: (i, j))
        scratch_shapes = [pltpu.VMEM((tm, tn), jnp.float32)]
        dims = ("parallel", "parallel", "arbitrary")

    # For skinny-M decode shapes, pipeline_mode=pl.Buffered(3) on the weight
    # BlockSpec can deepen prefetch; omitted here for portability.
    y = pl.pallas_call(
        kernel,
        out_shape=jax.ShapeDtypeStruct((M, N), out_dtype),
        grid_spec=pltpu.PrefetchScalarGridSpec(
            num_scalar_prefetch=0,
            grid=grid,
            in_specs=in_specs,
            out_specs=out_specs,
            scratch_shapes=scratch_shapes,
        ),
        compiler_params=pltpu.CompilerParams(
            dimension_semantics=dims,
            vmem_limit_bytes=int(vmem_limit),
        ),
        cost_estimate=cost,
    )(x2, w_t, b2)

    return y.reshape(lead + (N,))


def make_linear_params(key, dim_in, dim_out, dtype=jnp.float32):
    """Deterministic init matching nn.Linear's U(-1/sqrt(dim_in), 1/sqrt(dim_in))."""
    k_w, k_b = jax.random.split(key)
    bound = 1.0 / (dim_in ** 0.5)
    # PyTorch stores weight as (dim_out, dim_in); keep the transpose for the kernel.
    w = jax.random.uniform(k_w, (dim_out, dim_in), dtype, -bound, bound)
    b = jax.random.uniform(k_b, (dim_out,), dtype, -bound, bound)
    return w.T, b


if __name__ == "__main__":
    key = jax.random.PRNGKey(0)
    k1, k2, k3, k4 = jax.random.split(key, 4)

    # Case 1: small shapes implied by the module: x (2, 8, 32) -> Linear(32, 32).
    # Leading (batch, seq) dims are flattened into M by the wrapper.
    dim_in, dim_out = 32, 32
    x = jax.random.normal(k1, (2, 8, dim_in), jnp.float32)
    w_t, bias = make_linear_params(k2, dim_in, dim_out)
    # Persistent bf16 weight copy: done ONCE, outside the hot path.
    w_bf16 = w_t.astype(jnp.bfloat16)

    y = linear_pallas(x, w_bf16, bias)
    jax.block_until_ready(y)
    assert y.shape == (2, 8, dim_out)
    y_ref = (
        x.astype(jnp.bfloat16).astype(jnp.float32) @ w_bf16.astype(jnp.float32)
    ) + bias
    rel1 = jnp.max(jnp.abs(y - y_ref)) / (jnp.max(jnp.abs(y_ref)) + 1e-6)
    assert rel1 < 2e-2, float(rel1)

    # Case 2: non-tile-aligned shapes exercising edge tiles (no M/N padding)
    # and the multi-step K accumulation path (K > single-K threshold).
    M2, Kd, N2 = 300, 2304, 1300
    x2 = jax.random.normal(k3, (M2, Kd), jnp.float32)
    w2, b2 = make_linear_params(k4, Kd, N2)
    w2_bf16 = w2.astype(jnp.bfloat16)

    y2 = linear_pallas(x2, w2_bf16, b2)
    jax.block_until_ready(y2)
    assert y2.shape == (M2, N2)
    y2_ref = (
        x2.astype(jnp.bfloat16).astype(jnp.float32) @ w2_bf16.astype(jnp.float32)
    ) + b2
    rel2 = jnp.max(jnp.abs(y2 - y2_ref)) / (jnp.max(jnp.abs(y2_ref)) + 1e-6)
    assert rel2 < 2e-2, float(rel2)

    print("KERNEL_OK")
</pallas_src>

<mosaic_0001>
module attributes {stable_mosaic.version = 11 : i64} {
  func.func @_single_k_kernel(%arg0: i32, %arg1: i32, %arg2: memref<16x32xf32, #tpu.memory_space<vmem>>, %arg3: memref<32x32xbf16, #tpu.memory_space<vmem>>, %arg4: memref<1x32xf32, #tpu.memory_space<vmem>>, %arg5: memref<16x32xf32, #tpu.memory_space<vmem>>) attributes {dimension_semantics = [#tpu.dimension_semantics<parallel>, #tpu.dimension_semantics<parallel>], iteration_bounds = array<i64: 1, 1>, scalar_prefetch = 0 : i64, scratch_operands = 0 : i64, tpu.core_type = #tpu.core_type<tc>, window_params = [{transform_indices = @transform_0, window_bounds = array<i64: 16, 32>}, {transform_indices = @transform_1, window_bounds = array<i64: 32, 32>}, {transform_indices = @transform_2, window_bounds = array<i64: 1, 32>}, {transform_indices = @transform_3, window_bounds = array<i64: 16, 32>}]} {
    %c0 = arith.constant 0 : index
    %c0_0 = arith.constant 0 : index
    %0 = vector.load %arg2[%c0, %c0_0] : memref<16x32xf32, #tpu.memory_space<vmem>>, vector<16x32xf32>
    %c0_1 = arith.constant 0 : index
    %c0_2 = arith.constant 0 : index
    %1 = vector.load %arg3[%c0_1, %c0_2] : memref<32x32xbf16, #tpu.memory_space<vmem>>, vector<32x32xbf16>
    %2 = arith.truncf %0 : vector<16x32xf32> to vector<16x32xbf16>
    %cst = arith.constant dense<0.000000e+00> : vector<16x32xf32>
    %3 = tpu.matmul %2, %1, %cst {dimension_numbers = #tpu.dot_dimension_numbers<[1], [0], [0], [1], [0, 0, 1, 1], [], []>} : vector<16x32xbf16>, vector<32x32xbf16>, vector<16x32xf32> -> vector<16x32xf32>
    %c0_3 = arith.constant 0 : index
    %c0_4 = arith.constant 0 : index
    %4 = vector.load %arg4[%c0_3, %c0_4] : memref<1x32xf32, #tpu.memory_space<vmem>>, vector<1x32xf32>
    %5 = vector.broadcast %4 : vector<1x32xf32> to vector<16x32xf32>
    %6 = arith.addf %3, %5 : vector<16x32xf32>
    %c0_5 = arith.constant 0 : index
    %c0_6 = arith.constant 0 : index
    %7 = vector.load %arg5[%c0_5, %c0_6] : memref<16x32xf32, #tpu.memory_space<vmem>>, vector<16x32xf32>
    tpu.vector_store %arg5[%c0_5, %c0_6], %6 {strides = array<i32>} : memref<16x32xf32, #tpu.memory_space<vmem>>, vector<16x32xf32>,
    return
  }
  func.func @transform_0(%arg0: i32, %arg1: i32) -> (i32, i32) {
    %c0_i32 = arith.constant 0 : i32
    %c0_i32_0 = arith.constant 0 : i32
    return %arg0, %c0_i32 : i32, i32
  }
  func.func @transform_1(%arg0: i32, %arg1: i32) -> (i32, i32) {
    %c0_i32 = arith.constant 0 : i32
    %c0_i32_0 = arith.constant 0 : i32
    return %c0_i32, %arg1 : i32, i32
  }
  func.func @transform_2(%arg0: i32, %arg1: i32) -> (i32, i32) {
    %c0_i32 = arith.constant 0 : i32
    %c0_i32_0 = arith.constant 0 : i32
    return %c0_i32, %arg1 : i32, i32
  }
  func.func @transform_3(%arg0: i32, %arg1: i32) -> (i32, i32) {
    %c0_i32 = arith.constant 0 : i32
    return %arg0, %arg1 : i32, i32
  }
}

</mosaic_0001>

<bundles_post_ra>
// kernel: tpu_custom_call.1
= control target key start
LH: loop header
LB: loop body
LE: loop exit
PB: predicated region body
PF: predicated region fallthrough
CT: control target
= control target key end

     0   :  { %8 = vsyncpa [#allocation3], 0  ;;  %s307_s0 = inlined_call_operand.hbm [shape: f32[16,32], index: 0, kind: input, shape index: {}]   ;;  %s308_s1 = inlined_call_operand.hbm [shape: bf16[32,32], index: 1, kind: input, shape index: {}]   ;;  %s309_s2 = inlined_call_operand.vmem [shape: f32[1,32], index: 2, kind: input, shape index: {}]   ;;  %s310_s3 = inlined_call_operand.hbm [shape: f32[16,32], index: 3, kind: output, shape index: {}]  }
   0x1   :  { %9 = vsyncpa [#allocation6], 0 }
   0x2   :  { %10 = vsyncpa [#allocation4], 0  ;;  %s233_s12 = smov [#allocation2]   ;;  %s161_s16 = scalar_lea.hbm %s307_s0, 256 }
   0x3   :  { %s16_s13 = sshll.u32 %s233_s12, 4  ;;  %p162_p0 = scmp.ne.s32.totalorder %s307_s0, %s161_s16  ;;  %s17_s13 = int_to_ptr.vmem [resolvable:$true] %s16_s13 }
   0x4   :  { %p165_p1 = scmp.lt.u32.totalorder %s161_s16, %s307_s0 }
   0x6   :  { %p167_p2 = pnand %p165_p1, %p162_p0 }
   0x8   :  { %170 = shalt.err (!%p167_p2)
}
   0x9   :  { %s171_s21 = scalar_lea.vmem %s17_s13, 256  ;;  %p176_p4 = scmp.lt.s32.totalorder %s17_s13, %s17_s13 }
   0xa   :  { %p172_p3 = scmp.ne.s32.totalorder %s17_s13, %s171_s21  ;;  %p177_p5 = scmp.lt.s32.totalorder %s171_s21, %s171_s21 }
   0xc   :  { %p178_p6 = por %p177_p5, %p176_p4 }
   0xe   :  { %p179_p7 = pnand %p178_p6, %p172_p3 }
  0x10   :  { %182 = shalt.err (!%p179_p7)
}
  0x11   :  { %s234_s22 = smov 128   ;;  %s235_s23 = smov 8  }
  0x12   :  { %22 = dma.hbm_to_vmem [thread:$0]  %s307_s0, 256, %s17_s13, [#allocation3], %s234_s22, %s234_s22, %s235_s23  }
  0x13   :  { %s236_s26 = smov [#allocation5]   ;;  %s183_s30 = scalar_lea.hbm %s308_s1, 256 }
  0x14   :  { %s28_s27 = sshll.u32 %s236_s26, 4  ;;  %p184_p8 = scmp.ne.s32.totalorder %s308_s1, %s183_s30  ;;  %s29_s27 = int_to_ptr.vmem [resolvable:$true] %s28_s27 }
  0x15   :  { %p187_p9 = scmp.lt.u32.totalorder %s183_s30, %s308_s1 }
  0x17   :  { %p189_p10 = pnand %p187_p9, %p184_p8 }
  0x19   :  { %192 = shalt.err (!%p189_p10)
}
  0x1a   :  { %s193_s8 = scalar_lea.vmem %s29_s27, 256  ;;  %p198_p12 = scmp.lt.s32.totalorder %s29_s27, %s29_s27 }
  0x1b   :  { %p194_p11 = scmp.ne.s32.totalorder %s29_s27, %s193_s8  ;;  %p199_p13 = scmp.lt.s32.totalorder %s193_s8, %s193_s8 }
  0x1d   :  { %p200_p0 = por %p199_p13, %p198_p12 }
  0x1f   :  { %p201_p1 = pnand %p200_p0, %p194_p11 }
  0x21   :  { %204 = shalt.err (!%p201_p1)
}
  0x22   :  { %s237_s0 = smov 64   ;;  %s238_s9 = smov 4  }
  0x23   :  { %34 = dma.hbm_to_vmem [thread:$0]  %s308_s1, 256, %s29_s27, [#allocation6], %s237_s0, %s237_s0, %s238_s9  }
  0x24   :  { %227 = dma.done.wait [#allocation3], 256  }
  0x25   :  { %228 = vsyncadd [#allocation3], 4294967040 }
  0x26   :  { %229 = dma.done.wait [#allocation6], 256  }
  0x27   :  { %230 = vsyncadd [#allocation6], 4294967040  ;;  %v239_v0 = vmov 0.0   ;;  %vm240_vm0 = vmmov 0   ;;  %v159_v1 = vld [vmem:[#allocation5] sm:$0xff]   ;;  %v160_v2 = vld [vmem:[#allocation5 + $0x8] sm:$0xff]  }
  0x28   :  { %142 = vmatprep.subr.bf16.mxu0 %v239_v0  ;;  %146 = vmatprep.mubr.msk.bf16.mxu0 %vm240_vm0, %v239_v0  ;;  %v44_v3 = vld [vmem:[#allocation2] sm:$0xff]  ;;  %v45_v4 = vld [vmem:[#allocation2 + $0x8] sm:$0xff]  ;;  %vm70_vm1 = vcmask 261120   ;;  %s241_s13 = smov [#allocation7]  }
  0x29   :  { %143 = vmatpush3.bf16.msra.mxu0 %v159_v1  ;;  %v50_v5 = vpack.c.bf16 %v45_v4, %v44_v3  ;;  %v135_v6 = vld [vmem:[%s309_s2] ss:$0 sm:$0xff]  ;;  %s122_s14 = sshll.u32 %s241_s13, 4  ;;  %s123_s14 = int_to_ptr.vmem [resolvable:$true] %s122_s14 }
  0x2a   :  { %144 = vmatprep.subr.bf16.mxu0 %v239_v0  ;;  %s205_s15 = scalar_lea.vmem %s123_s14, 256  ;;  %p210_p3 = scmp.lt.s32.totalorder %s123_s14, %s123_s14 }
  0x2b   :  { %p206_p2 = scmp.ne.s32.totalorder %s123_s14, %s205_s15  ;;  %p211_p4 = scmp.lt.s32.totalorder %s205_s15, %s205_s15 }
  0x2d   :  { %145 = vmatpush3.bf16.msra.mxu0 %v160_v2  ;;  %p212_p5 = por %p211_p4, %p210_p3 }
  0x2f   :  { %p213_p6 = pnand %p212_p5, %p206_p2 }
  0x30   :  { %147 = vmatmul.mubr.msk.bf16.vlgmr.msra.gmra.mrb[0].mxu0 %vm70_vm1, %v50_v5 }
 0x103   :  { %v108_v7 = vpop.f32.mrb[0].mxu0 }
 0x104   :  { %v109_v8 = vadd.f32 %v135_v6, %v108_v7  ;;  %v148_v9 = vpop.f32.mrb[1].mxu0 }
 0x105   :  { %v111_v10 = vpop.f32.mrb[2].mxu0 }
 0x106   :  { %115 = vst.msk [vmem:[#allocation7] sm:$0xff] %vm70_vm1, %v109_v8  ;;  %v112_v11 = vadd.f32 %v135_v6, %v111_v10  ;;  %v149_v12 = vpop.f32.mrb[3].mxu0 }
 0x108   :  { %116 = vst.msk [vmem:[#allocation7 + $0x8] sm:$0xff] %vm70_vm1, %v112_v11 }
 0x109   :  { %216 = shalt.err (!%p213_p6)
}
 0x10a   :  { %s217_s17 = scalar_lea.hbm %s310_s3, 256 }
 0x10b   :  { %p218_p7 = scmp.ne.s32.totalorder %s310_s3, %s217_s17  ;;  %p221_p8 = scmp.lt.u32.totalorder %s217_s17, %s310_s3 }
 0x10d   :  { %p223_p9 = pnand %p221_p8, %p218_p7 }
 0x10f   :  { %226 = shalt.err (!%p223_p9)
}
 0x110   :  { %128 = dma.vmem_to_hbm [thread:$0]  %s123_s14, 256, %s310_s3, [#allocation4], %s234_s22, %s234_s22, %s235_s23  }
 0x111   :  { %231 = dma.done.wait [#allocation4], 256  }
 0x112   :  { %232 = vsyncadd [#allocation4], 4294967040 }
 0x113   :  { %132 = vsyncpa [#allocation3], 1 }
 0x114   :  { %133 = vsyncpa [#allocation6], 1 }
 0x115   :  { %134 = vsyncpa [#allocation4], 1 }

</bundles_post_ra>
